<compile_context>
chip_gen: v7x
topology: tpu7x:2x2x1
jax: 0.10.0
libtpu: 0.0.40
codegen_flags: <defaults>
</compile_context>

<pallas_src>
import functools

import jax
import jax.numpy as jnp
from jax.experimental import pallas as pl
from jax.experimental.pallas import tpu as pltpu


def _round_up(x, m):
    return ((x + m - 1) // m) * m


def _fused_gcn_kernel(a_ref, x_ref, w1_ref, w2_ref, alpha_ref,
                      o_ref, xw_ref, h_ref, *, tm):
    """One grid step = (view v, layer l, row-tile t).

    layer 0, tile 0 : XW1 = X[v] @ W1                      -> xw_ref (VMEM)
    layer 0, tile t : h[rows_t] = PReLU(A[v, rows_t] @ XW1) -> h_ref  (VMEM)
    layer 1, tile 0 : HW2 = h @ W2                          -> xw_ref (reused)
    layer 1, tile t : z[rows_t] = A[v, rows_t] @ HW2        -> HBM output
    """
    layer = pl.program_id(1)
    t = pl.program_id(2)
    row0 = pl.multiple_of(t * tm, tm)

    @pl.when((layer == 0) & (t == 0))
    def _():
        # Hoisted per-view projection: done once, shared by every row tile.
        xw = jnp.dot(x_ref[...], w1_ref[...],
                     preferred_element_type=jnp.float32)             # MXU
        xw_ref[...] = xw.astype(xw_ref.dtype)

    @pl.when(layer == 0)
    def _():
        alpha = alpha_ref[0]                                         # SMEM scalar
        h = jnp.dot(a_ref[...], xw_ref[...],
                    preferred_element_type=jnp.float32)              # MXU
        h = jnp.where(h >= 0.0, h, alpha * h)                        # PReLU (VPU)
        h_ref[pl.ds(row0, tm), :] = h.astype(h_ref.dtype)            # stays in VMEM

    @pl.when((layer == 1) & (t == 0))
    def _():
        # Reuse xw_ref: per-view H @ W2, shared by every row tile of layer 1.
        hw = jnp.dot(h_ref[...], w2_ref[...],
                     preferred_element_type=jnp.float32)             # MXU
        xw_ref[...] = hw.astype(xw_ref.dtype)

    @pl.when(layer == 1)
    def _():
        z = jnp.dot(a_ref[...], xw_ref[...],
                    preferred_element_type=jnp.float32)              # MXU
        o_ref[...] = z.astype(o_ref.dtype)                           # lane-dense store


def gcn_encoder_batched(adj_stack, feat_stack, params):
    """Run the 2-layer GCN on a stack of V graph views in a single pallas_call."""
    v, n, _ = adj_stack.shape
    f_in = feat_stack.shape[-1]
    h_dim = params["w1"].shape[1]
    out_dim = params["w2"].shape[1]

    # --- pad to TPU-friendly shapes -------------------------------------
    n_pad = _round_up(n, 8) if n <= 256 else _round_up(n, 256)
    tm = min(n_pad, 256)                 # A row-tile (double-buffered by Pallas)
    n_tiles = n_pad // tm
    f_pad = _round_up(f_in, 128)         # lane-dense MXU contraction dim
    c_pad = max(_round_up(h_dim, 128), _round_up(out_dim, 128))

    bf16 = jnp.bfloat16
    a = jnp.zeros((v, n_pad, n_pad), bf16).at[:, :n, :n].set(
        adj_stack.astype(bf16))
    x = jnp.zeros((v, n_pad, f_pad), bf16).at[:, :n, :f_in].set(
        feat_stack.astype(bf16))
    w1 = jnp.zeros((f_pad, c_pad), bf16).at[:f_in, :h_dim].set(
        params["w1"].astype(bf16))
    w2 = jnp.zeros((c_pad, c_pad), bf16).at[:h_dim, :out_dim].set(
        params["w2"].astype(bf16))
    alpha = params["alpha"].astype(jnp.float32).reshape((1,))

    kernel = functools.partial(_fused_gcn_kernel, tm=tm)
    out = pl.pallas_call(
        kernel,
        out_shape=jax.ShapeDtypeStruct((v, n_pad, c_pad), jnp.float32),
        grid_spec=pltpu.PrefetchScalarGridSpec(
            num_scalar_prefetch=0,
            grid=(v, 2, n_tiles),
            in_specs=[
                # A[v] row tile (tm, n_pad), streamed per layer / per tile.
                pl.BlockSpec((None, tm, n_pad), lambda vi, li, ti: (vi, ti, 0)),
                # X[v] full; block index only changes with the view -> 1 DMA/view.
                pl.BlockSpec((None, n_pad, f_pad), lambda vi, li, ti: (vi, 0, 0)),
                pl.BlockSpec((f_pad, c_pad), lambda vi, li, ti: (0, 0)),
                pl.BlockSpec((c_pad, c_pad), lambda vi, li, ti: (0, 0)),
                pl.BlockSpec(memory_space=pltpu.SMEM),   # PReLU alpha
            ],
            # Output block only advances during layer 1 (li * ti == 0 while li == 0),
            # so layer-0 steps never force a writeback of untouched output blocks.
            out_specs=pl.BlockSpec((None, tm, c_pad),
                                   lambda vi, li, ti: (vi, li * ti, 0)),
            scratch_shapes=[
                pltpu.VMEM((n_pad, c_pad), bf16),   # XW1 (layer 0) / HW2 (layer 1)
                pltpu.VMEM((n_pad, c_pad), bf16),   # hidden state H for current view
            ],
        ),
        compiler_params=pltpu.CompilerParams(
            # View axis is independent -> shardable across TensorCores (v7x).
            # Layer / row-tile axes carry the scratch dependency -> arbitrary.
            dimension_semantics=("parallel", "arbitrary", "arbitrary"),
            # Raised above the v5e 16 MiB scoped default; still within every
            # chip's physical VMEM. Raise further for large row tiles at scale.
            vmem_limit_bytes=32 * 1024 * 1024,
        ),
    )(a, x, w1, w2, alpha)

    return out[:, :n, :out_dim]


def encoder_forward(graph1, graph2, feat1, feat2, graph, feat, params):
    """Pallas equivalent of HomoGCL Encoder.forward."""
    adj_stack = jnp.stack([graph1, graph2, graph])
    feat_stack = jnp.stack([feat1, feat2, feat])
    z_all = gcn_encoder_batched(adj_stack, feat_stack, params)
    num_nodes = graph.shape[0]  # graph.number_of_nodes()
    return z_all[0], z_all[1], z_all[2], graph1, graph2, num_nodes


# ---------------------------- glue / reference ------------------------------

def _gcn_encoder_ref(adj, x, params):
    h = adj @ (x @ params["w1"])
    h = jnp.where(h >= 0.0, h, params["alpha"][0] * h)
    return adj @ (h @ params["w2"])


def gcn_normalize(adj):
    # A_hat = D^-1/2 (A + I) D^-1/2   (plain-JAX glue, not the hot path)
    n = adj.shape[0]
    a = adj + jnp.eye(n, dtype=adj.dtype)
    deg = jnp.sum(a, axis=1)
    d_inv_sqrt = jnp.where(deg > 0, 1.0 / jnp.sqrt(deg), 0.0)
    return a * d_inv_sqrt[:, None] * d_inv_sqrt[None, :]


def make_random_graph(key, n, p=0.2):
    u = jax.random.uniform(key, (n, n))
    a = (u < p).astype(jnp.float32)
    a = jnp.maximum(a, a.T)                        # symmetric
    a = a * (1.0 - jnp.eye(n, dtype=jnp.float32))  # no self loops (added in norm)
    return a


if __name__ == "__main__":
    key = jax.random.PRNGKey(0)
    n_nodes = 32
    in_feat = 16
    hidden_dim = 32

    keys = jax.random.split(key, 8)

    # Deterministic parameter init (Glorot-ish), PReLU slope = 0.25 (torch default).
    w1 = jax.random.normal(keys[0], (in_feat, hidden_dim), jnp.float32) * (
        1.0 / jnp.sqrt(in_feat))
    w2 = jax.random.normal(keys[1], (hidden_dim, hidden_dim), jnp.float32) * (
        1.0 / jnp.sqrt(hidden_dim))
    alpha = jnp.array([0.25], dtype=jnp.float32)
    params = {"w1": w1, "w2": w2, "alpha": alpha}

    # Original graph + two augmented views (different random graphs/features).
    graph = gcn_normalize(make_random_graph(keys[2], n_nodes))
    graph1 = gcn_normalize(make_random_graph(keys[3], n_nodes))
    graph2 = gcn_normalize(make_random_graph(keys[4], n_nodes))
    feat = jax.random.normal(keys[5], (n_nodes, in_feat), jnp.float32)
    feat1 = jax.random.normal(keys[6], (n_nodes, in_feat), jnp.float32)
    feat2 = jax.random.normal(keys[7], (n_nodes, in_feat), jnp.float32)

    z1, z2, z, g1_out, g2_out, num_nodes = encoder_forward(
        graph1, graph2, feat1, feat2, graph, feat, params)
    jax.block_until_ready((z1, z2, z, g1_out, g2_out))

    # Pure-JAX f32 reference; bf16 MXU inputs -> loose tolerance.
    for z_k, (g_k, f_k) in zip(
            (z1, z2, z), ((graph1, feat1), (graph2, feat2), (graph, feat))):
        ref = _gcn_encoder_ref(g_k, f_k, params)
        err = float(jnp.max(jnp.abs(z_k - ref)))
        assert jnp.allclose(z_k, ref, rtol=5e-2, atol=8e-2), err

    assert z1.shape == (n_nodes, hidden_dim)
    assert z2.shape == (n_nodes, hidden_dim)
    assert z.shape == (n_nodes, hidden_dim)
    assert num_nodes == n_nodes
    print("KERNEL_OK")
</pallas_src>

<mosaic_0001>
module attributes {stable_mosaic.version = 11 : i64} {
  func.func @_fused_gcn_kernel(%arg0: i32, %arg1: i32, %arg2: i32, %arg3: memref<1x32x32xbf16, #tpu.memory_space<vmem>>, %arg4: memref<1x32x128xbf16, #tpu.memory_space<vmem>>, %arg5: memref<128x128xbf16, #tpu.memory_space<vmem>>, %arg6: memref<128x128xbf16, #tpu.memory_space<vmem>>, %arg7: memref<1xf32, #tpu.memory_space<smem>>, %arg8: memref<1x32x128xf32, #tpu.memory_space<vmem>>, %arg9: memref<32x128xbf16, #tpu.memory_space<vmem>>, %arg10: memref<32x128xbf16, #tpu.memory_space<vmem>>) attributes {dimension_semantics = [#tpu.dimension_semantics<parallel>, #tpu.dimension_semantics<arbitrary>, #tpu.dimension_semantics<arbitrary>], iteration_bounds = array<i64: 3, 2, 1>, scalar_prefetch = 0 : i64, scratch_operands = 2 : i64, tpu.core_type = #tpu.core_type<tc>, window_params = [{transform_indices = @transform_0, window_bounds = array<i64: 1, 32, 32>}, {transform_indices = @transform_1, window_bounds = array<i64: 1, 32, 128>}, {pipeline_mode = #tpu.pipeline_mode<synchronous>, transform_indices = @transform_2, window_bounds = array<i64: 128, 128>}, {pipeline_mode = #tpu.pipeline_mode<synchronous>, transform_indices = @transform_3, window_bounds = array<i64: 128, 128>}, {transform_indices = @transform_4, window_bounds = array<i64: 1>}, {transform_indices = @transform_5, window_bounds = array<i64: 1, 32, 128>}]} {
    %c32_i32 = arith.constant 32 : i32
    %0 = arith.muli %arg2, %c32_i32 : i32
    %1 = tpu.assume_multiple %0, 32 : i32
    %c0_i32 = arith.constant 0 : i32
    %2 = arith.cmpi eq, %arg1, %c0_i32 : i32
    %c0_i32_0 = arith.constant 0 : i32
    %3 = arith.cmpi eq, %arg2, %c0_i32_0 : i32
    %4 = arith.andi %2, %3 : i1
    %5 = arith.extui %4 : i1 to i32
    %c0_i32_1 = arith.constant 0 : i32
    %6 = arith.cmpi ne, %5, %c0_i32_1 : i32
    scf.if %6 {
      %c0 = arith.constant 0 : index
      %c0_8 = arith.constant 0 : index
      %c0_9 = arith.constant 0 : index
      %18 = vector.load %arg4[%c0, %c0_8, %c0_9] : memref<1x32x128xbf16, #tpu.memory_space<vmem>>, vector<1x32x128xbf16>
      %19 = vector.shape_cast %18 : vector<1x32x128xbf16> to vector<32x128xbf16>
      %c0_10 = arith.constant 0 : index
      %c0_11 = arith.constant 0 : index
      %20 = vector.load %arg5[%c0_10, %c0_11] : memref<128x128xbf16, #tpu.memory_space<vmem>>, vector<128x128xbf16>
      %cst = arith.constant dense<0.000000e+00> : vector<32x128xf32>
      %21 = tpu.matmul %19, %20, %cst {dimension_numbers = #tpu.dot_dimension_numbers<[1], [0], [0], [1], [0, 0, 1, 1], [], []>} : vector<32x128xbf16>, vector<128x128xbf16>, vector<32x128xf32> -> vector<32x128xf32>
      %22 = arith.truncf %21 : vector<32x128xf32> to vector<32x128xbf16>
      %c0_12 = arith.constant 0 : index
      %c0_13 = arith.constant 0 : index
      %23 = vector.load %arg9[%c0_12, %c0_13] : memref<32x128xbf16, #tpu.memory_space<vmem>>, vector<32x128xbf16>
      tpu.vector_store %arg9[%c0_12, %c0_13], %22 {strides = array<i32>} : memref<32x128xbf16, #tpu.memory_space<vmem>>, vector<32x128xbf16>,
    } else {
    }
    %c0_i32_2 = arith.constant 0 : i32
    %7 = arith.cmpi eq, %arg1, %c0_i32_2 : i32
    %8 = arith.extui %7 : i1 to i32
    %c0_i32_3 = arith.constant 0 : i32
    %9 = arith.cmpi ne, %8, %c0_i32_3 : i32
    scf.if %9 {
      %c0 = arith.constant 0 : index
      %18 = memref.load %arg7[%c0] : memref<1xf32, #tpu.memory_space<smem>>
      %c0_8 = arith.constant 0 : index
      %c0_9 = arith.constant 0 : index
      %c0_10 = arith.constant 0 : index
      %19 = vector.load %arg3[%c0_8, %c0_9, %c0_10] : memref<1x32x32xbf16, #tpu.memory_space<vmem>>, vector<1x32x32xbf16>
      %20 = vector.shape_cast %19 : vector<1x32x32xbf16> to vector<32x32xbf16>
      %c0_11 = arith.constant 0 : index
      %c0_12 = arith.constant 0 : index
      %21 = vector.load %arg9[%c0_11, %c0_12] : memref<32x128xbf16, #tpu.memory_space<vmem>>, vector<32x128xbf16>
      %cst = arith.constant dense<0.000000e+00> : vector<32x128xf32>
      %22 = tpu.matmul %20, %21, %cst {dimension_numbers = #tpu.dot_dimension_numbers<[1], [0], [0], [1], [0, 0, 1, 1], [], []>} : vector<32x32xbf16>, vector<32x128xbf16>, vector<32x128xf32> -> vector<32x128xf32>
      %cst_13 = arith.constant 0.000000e+00 : f32
      %23 = vector.broadcast %cst_13 : f32 to vector<32x128xf32>
      %24 = arith.cmpf oge, %22, %23 : vector<32x128xf32>
      %25 = vector.broadcast %18 : f32 to vector<32x128xf32>
      %26 = arith.mulf %25, %22 : vector<32x128xf32>
      %27 = arith.select %24, %22, %26 : vector<32x128xi1>, vector<32x128xf32>
      %28 = arith.truncf %27 : vector<32x128xf32> to vector<32x128xbf16>
      %29 = arith.index_cast %1 : i32 to index
      %c0_14 = arith.constant 0 : index
      %30 = vector.load %arg10[%29, %c0_14] : memref<32x128xbf16, #tpu.memory_space<vmem>>, vector<32x128xbf16>
      tpu.vector_store %arg10[%29, %c0_14], %28 {strides = array<i32>} : memref<32x128xbf16, #tpu.memory_space<vmem>>, vector<32x128xbf16>,
    } else {
    }
    %c1_i32 = arith.constant 1 : i32
    %10 = arith.cmpi eq, %arg1, %c1_i32 : i32
    %c0_i32_4 = arith.constant 0 : i32
    %11 = arith.cmpi eq, %arg2, %c0_i32_4 : i32
    %12 = arith.andi %10, %11 : i1
    %13 = arith.extui %12 : i1 to i32
    %c0_i32_5 = arith.constant 0 : i32
    %14 = arith.cmpi ne, %13, %c0_i32_5 : i32
    scf.if %14 {
      %c0 = arith.constant 0 : index
      %c0_8 = arith.constant 0 : index
      %18 = vector.load %arg10[%c0, %c0_8] : memref<32x128xbf16, #tpu.memory_space<vmem>>, vector<32x128xbf16>
      %c0_9 = arith.constant 0 : index
      %c0_10 = arith.constant 0 : index
      %19 = vector.load %arg6[%c0_9, %c0_10] : memref<128x128xbf16, #tpu.memory_space<vmem>>, vector<128x128xbf16>
      %cst = arith.constant dense<0.000000e+00> : vector<32x128xf32>
      %20 = tpu.matmul %18, %19, %cst {dimension_numbers = #tpu.dot_dimension_numbers<[1], [0], [0], [1], [0, 0, 1, 1], [], []>} : vector<32x128xbf16>, vector<128x128xbf16>, vector<32x128xf32> -> vector<32x128xf32>
      %21 = arith.truncf %20 : vector<32x128xf32> to vector<32x128xbf16>
      %c0_11 = arith.constant 0 : index
      %c0_12 = arith.constant 0 : index
      %22 = vector.load %arg9[%c0_11, %c0_12] : memref<32x128xbf16, #tpu.memory_space<vmem>>, vector<32x128xbf16>
      tpu.vector_store %arg9[%c0_11, %c0_12], %21 {strides = array<i32>} : memref<32x128xbf16, #tpu.memory_space<vmem>>, vector<32x128xbf16>,
    } else {
    }
    %c1_i32_6 = arith.constant 1 : i32
    %15 = arith.cmpi eq, %arg1, %c1_i32_6 : i32
    %16 = arith.extui %15 : i1 to i32
    %c0_i32_7 = arith.constant 0 : i32
    %17 = arith.cmpi ne, %16, %c0_i32_7 : i32
    scf.if %17 {
      %c0 = arith.constant 0 : index
      %c0_8 = arith.constant 0 : index
      %c0_9 = arith.constant 0 : index
      %18 = vector.load %arg3[%c0, %c0_8, %c0_9] : memref<1x32x32xbf16, #tpu.memory_space<vmem>>, vector<1x32x32xbf16>
      %19 = vector.shape_cast %18 : vector<1x32x32xbf16> to vector<32x32xbf16>
      %c0_10 = arith.constant 0 : index
      %c0_11 = arith.constant 0 : index
      %20 = vector.load %arg9[%c0_10, %c0_11] : memref<32x128xbf16, #tpu.memory_space<vmem>>, vector<32x128xbf16>
      %cst = arith.constant dense<0.000000e+00> : vector<32x128xf32>
      %21 = tpu.matmul %19, %20, %cst {dimension_numbers = #tpu.dot_dimension_numbers<[1], [0], [0], [1], [0, 0, 1, 1], [], []>} : vector<32x32xbf16>, vector<32x128xbf16>, vector<32x128xf32> -> vector<32x128xf32>
      %c0_12 = arith.constant 0 : index
      %c0_13 = arith.constant 0 : index
      %c0_14 = arith.constant 0 : index
      %22 = vector.load %arg8[%c0_12, %c0_13, %c0_14] : memref<1x32x128xf32, #tpu.memory_space<vmem>>, vector<1x32x128xf32>
      %23 = vector.shape_cast %22 : vector<1x32x128xf32> to vector<32x128xf32>
      %24 = vector.shape_cast %21 : vector<32x128xf32> to vector<1x32x128xf32>
      tpu.vector_store %arg8[%c0_12, %c0_13, %c0_14], %24 {strides = array<i32>} : memref<1x32x128xf32, #tpu.memory_space<vmem>>, vector<1x32x128xf32>,
    } else {
    }
    return
  }
  func.func @transform_0(%arg0: i32, %arg1: i32, %arg2: i32) -> (i32, i32, i32) {
    %c0_i32 = arith.constant 0 : i32
    %c0_i32_0 = arith.constant 0 : i32
    return %arg0, %arg2, %c0_i32 : i32, i32, i32
  }
  func.func @transform_1(%arg0: i32, %arg1: i32, %arg2: i32) -> (i32, i32, i32) {
    %c0_i32 = arith.constant 0 : i32
    %c0_i32_0 = arith.constant 0 : i32
    %c0_i32_1 = arith.constant 0 : i32
    return %arg0, %c0_i32, %c0_i32_0 : i32, i32, i32
  }
  func.func @transform_2(%arg0: i32, %arg1: i32, %arg2: i32) -> (i32, i32) {
    %c0_i32 = arith.constant 0 : i32
    %c0_i32_0 = arith.constant 0 : i32
    %c0_i32_1 = arith.constant 0 : i32
    return %c0_i32, %c0_i32_0 : i32, i32
  }
  func.func @transform_3(%arg0: i32, %arg1: i32, %arg2: i32) -> (i32, i32) {
    %c0_i32 = arith.constant 0 : i32
    %c0_i32_0 = arith.constant 0 : i32
    %c0_i32_1 = arith.constant 0 : i32
    return %c0_i32, %c0_i32_0 : i32, i32
  }
  func.func @transform_4(%arg0: i32, %arg1: i32, %arg2: i32) -> i32 {
    %c0_i32 = arith.constant 0 : i32
    %c0_i32_0 = arith.constant 0 : i32
    return %c0_i32 : i32
  }
  func.func @transform_5(%arg0: i32, %arg1: i32, %arg2: i32) -> (i32, i32, i32) {
    %0 = arith.muli %arg1, %arg2 : i32
    %c0_i32 = arith.constant 0 : i32
    %c0_i32_0 = arith.constant 0 : i32
    return %arg0, %0, %c0_i32 : i32, i32, i32
  }
}

</mosaic_0001>

<bundles_post_ra>
// kernel: tpu_custom_call.1
= control target key start
LH: loop header
LB: loop body
LE: loop exit
PB: predicated region body
PF: predicated region fallthrough
CT: control target
= control target key end

     0   :  { %s1831_s0 = inlined_call_operand.hbm [shape: bf16[3,32,32], index: 0, kind: input, shape index: {}]   ;;  %s1832_s1 = inlined_call_operand.hbm [shape: bf16[3,32,128], index: 1, kind: input, shape index: {}]   ;;  %s1833_s2 = inlined_call_operand.hbm [shape: bf16[128,128], index: 2, kind: input, shape index: {}]   ;;  %s1834_s3 = inlined_call_operand.hbm [shape: bf16[128,128], index: 3, kind: input, shape index: {}]   ;;  %s1835_s4 = inlined_call_operand.<no memory space> [shape: f32[1], index: 4, kind: input, shape index: {}]   ;;  %s1836_s5 = inlined_call_operand.hbm [shape: f32[3,32,128], index: 5, kind: output, shape index: {}]  }
   0x1   :  { %1847 = sst [smem:[#allocation22_spill]] %s1831_s0 }
   0x2   :  { %1848 = sst [smem:[#allocation23_spill]] %s1833_s2 }
   0x3   :  { %1849 = sst [smem:[#allocation24_spill]] %s1834_s3 }
   0x4   :  { %10 = sst [smem:[#allocation4]] %s1835_s4 }
   0x5   :  { %11 = vsyncpa [#allocation6], 0 }
   0x6   :  { %13 = vsyncpa [#allocation6 + $0x1], 0 }
   0x7   :  { %14 = vsyncpa [#allocation9], 0 }
   0x8   :  { %16 = vsyncpa [#allocation9 + $0x1], 0 }
   0x9   :  { %17 = vsyncpa [#allocation12], 0 }
   0xa   :  { %18 = vsyncpa [#allocation7], 0 }
   0xb   :  { %20 = vsyncpa [#allocation7 + $0x1], 0  ;;  %s1480_s20 = smov 0   ;;  %s1482_s21 = smov 0  }
   0xc   :  { %s1484_s22 = smov 0   ;;  %s1486_s23 = smov 0  }
   0xd   :  { %s1488_s24 = smov 0   ;;  %s1490_s25 = smov 0  }
   0xe   :  { %s1492_s4 = smov 0   ;;  %s1494_s26 = smov 0  }
   0xf LB: > { %1850 = sst [smem:[#allocation19_spill]] %s1428_s25  ;;  %s1521_s27 = sadd.s32 4294967295, %s1436_s26   ;;  %s1436_s26 = sphi %s1494_s26, %s26_s26   ;;  %s1432_s4 = sphi %s1492_s4, %s1881_s4   ;;  %s1428_s25 = sphi %s1490_s25, %s1875_s25   ;;  %s1424_s24 = sphi %s1488_s24, %s1880_s24   ;;  %s1420_s23 = sphi %s1486_s23, %s1874_s23   ;;  %s1416_s22 = sphi %s1484_s22, %s1879_s22   ;;  %s1412_s21 = sphi %s1482_s21, %s1878_s21   ;;  %s1408_s20 = sphi %s1480_s20, %s1877_s20  }
  0x10   : > { %s939_s28 = sadd.s32 4294967294, %s1436_s26   ;;  %p67_p0 = scmp.ne.s32.totalorder %s1412_s21, %s1408_s20 }
  0x11   : > { %p1837_p1 = scmp.eq.s32.totalorder %s1521_s27, 0  ;;  %p190_p3 = scmp.eq.s32.totalorder %s939_s28, 5 }
  0x12   : > { %p940_p5 = scmp.ge.s32.totalorder %s1436_s26, 1  ;;  %p197_p7 = scmp.lt.s32.totalorder %s1436_s26, 7 }
  0x13   : > { %p1530_p4 = por %p1837_p1, %p67_p0  ;;  %p1535_p6 = por %p190_p3, %p67_p0 }
  0x14   : > { %p1540_p8 = pnand %p940_p5, %p197_p7  ;;  %s1438_s7 = smov [#allocation10]  }
  0x15   : > { %s1851_s29 = scalar_select %p1530_p4, 1, 0 }
  0x16   : > { %s1852_s30 = scalar_select %p1535_p6, 1, 0 }
  0x17   : > { %s1853_s6 = scalar_select %p1540_p8, 1, 0 }
  0x18   : > { %s209_s8 = sshll.u32 %s1438_s7, 4  ;;  %p1094_p9 = pneg %p1540_p8  ;;  %s210_s8 = int_to_ptr.vmem [resolvable:$true] %s209_s8 }
  0x19   : > { %s1439_s10 = smov [#allocation11]   ;;  %s1855_s2 = sld [smem:[#allocation23_spill]] }
  0x1a   : > { %p1548_p10 = pnand %p1094_p9, %p1837_p1  ;;  %s222_s11 = sshll.u32 %s1439_s10, 4  ;;  %s1552_s11 = int_to_ptr.vmem [resolvable:$true] %s222_s11 }
  0x1c   : > { %p1212_p12 = pneg %p1548_p10 }
  0x1f   : > { %s1210_s14 = scalar_lea.hbm %s1855_s2, 1024 }
  0x20   : > { %p1211_p11 = scmp.ne.s32.totalorder %s1855_s2, %s1210_s14  ;;  %p1217_p3 = scmp.lt.u32.totalorder %s1210_s14, %s1855_s2 }
  0x22   : > { %p1213_p13 = pnand %p1212_p12, %p1211_p11 }
  0x24   : > { %p1214_p0 = pneg %p1213_p13 }
  0x26   : > { %p1219_p5 = pnand %p1217_p3, %p1214_p0 }
  0x28   : > { %1222 = shalt.err (!%p1219_p5)
}
  0x29   : > { %s1223_s19 = scalar_lea.vmem %s210_s8, 1024  ;;  %p1231_p2 = scmp.lt.s32.totalorder %s210_s8, %s210_s8 }
  0x2a   : > { %p1224_p7 = scmp.ne.s32.totalorder %s210_s8, %s1223_s19  ;;  %p1232_p6 = scmp.lt.s32.totalorder %s1223_s19, %s1223_s19 }
  0x2c   : > { %p1226_p9 = pnand %p1224_p7, %p1212_p12  ;;  %p1233_p4 = por %p1232_p6, %p1231_p2 }
  0x2e   : > { %p1227_p1 = pneg %p1226_p9 }
  0x30   : > { %p1234_p8 = pnand %p1233_p4, %p1227_p1 }
  0x32   : > { %1237 = shalt.err (!%p1234_p8)
}
  0x33   : > { %s1840_s28 = smov 64   ;;  %s1842_s7 = smov 4  }
  0x34   : > { %1097 = dma.hbm_to_vmem [thread:$0]  (!%p1548_p10), %s1855_s2, 1024, %s210_s8, [#allocation9], %s1840_s28, %s1840_s28, %s1842_s7  }
  0x35   : > { %s1856_s3 = sld [smem:[#allocation24_spill]] }
  0x3b   : > { %s1238_s15 = scalar_lea.hbm %s1856_s3, 1024 }
  0x3c   : > { %p1239_p1 = scmp.ne.s32.totalorder %s1856_s3, %s1238_s15  ;;  %p1245_p6 = scmp.lt.u32.totalorder %s1238_s15, %s1856_s3 }
  0x3e   : > { %p1241_p2 = pnand %p1239_p1, %p1212_p12 }
  0x40   : > { %p1242_p4 = pneg %p1241_p2 }
  0x42   : > { %p1247_p8 = pnand %p1245_p6, %p1242_p4 }
  0x44   : > { %1250 = shalt.err (!%p1247_p8)
}
  0x45   : > { %s1251_s8 = scalar_lea.vmem %s1552_s11, 1024  ;;  %p1259_p3 = scmp.lt.s32.totalorder %s1552_s11, %s1552_s11 }
  0x46   : > { %p1252_p11 = scmp.ne.s32.totalorder %s1552_s11, %s1251_s8  ;;  %p1260_p5 = scmp.lt.s32.totalorder %s1251_s8, %s1251_s8 }
  0x48   : > { %p1254_p13 = pnand %p1252_p11, %p1212_p12  ;;  %p1261_p7 = por %p1260_p5, %p1259_p3 }
  0x4a   : > { %p1255_p0 = pneg %p1254_p13 }
  0x4c   : > { %p1262_p9 = pnand %p1261_p7, %p1255_p0 }
  0x4e   : > { %1265 = shalt.err (!%p1262_p9)
}
  0x4f   : > { %1100 = dma.hbm_to_vmem [thread:$0]  (!%p1548_p10), %s1856_s3, 1024, %s1552_s11, [#allocation12], %s1840_s28, %s1840_s28, %s1842_s7  }
  0x50   : > { %s41_s9 = sadd.s32 1, %s1428_s25  ;;  %s45_s13 = sadd.s32 1, %s1432_s4 }
  0x51   : > { %p43_p12 = scmp.ge.s32.totalorder %s41_s9, 2  ;;  %s54_s14 = sadd.s32 1, %s1416_s22 }
  0x52   : > { %p61_p1 = scmp.ne.s32.totalorder %s1416_s22, %s1412_s21  ;;  %p62_p2 = scmp.eq.s32.totalorder %s1436_s26, 0 }
  0x53   : > { %s1883_s9 = smov (%p43_p12, %s41_s9), 0  ;;  %s1885_s13 = smov (!%p43_p12, %s45_s13), %s1432_s4 }
  0x54   : > { %1857 = sst [smem:[#allocation20_spill]] %s1883_s9  ;;  %p1616_p4 = por %p62_p2, %p61_p1 }
  0x55   : > { %p1859_p6 = scmp.eq.s32.totalorder %s1521_s27, 5  ;;  %p47_p10 = scmp.ge.s32.totalorder %s1885_s13, 3 }
  0x56   : > { %p1114_p11 = scmp.lt.s32.totalorder %s1436_s26, 6  ;;  %s239_s16 = sand.u32 1, %s1416_s22  }
  0x57   : > { %p1622_p8 = por %p1859_p6, %p61_p1  ;;  %s1844_s17 = sshll.u32 %s1432_s4, 8 }
  0x58   : > { %s1887_s13 = smov (%p47_p10, %s1885_s13), 0  ;;  %s1631_s18 = sshll.u32 %s239_s16, 4 }
  0x59   : > { %1861 = sst [smem:[#allocation21_spill]] %s1887_s13  ;;  %s49_s19 = ssub.s32 %s1432_s4, %s1887_s13 }
  0x5a   : > { %p52_p13 = scmp.eq.s32.totalorder %s49_s19, 0  ;;  %s1862_s0 = sld [smem:[#allocation22_spill]] }
  0x5b   : > { %s243_s28 = scalar_lea.vmem [#allocation5], %s1631_s18  ;;  %p1645_p0 = pnand %p1114_p11, %p1616_p4 }
  0x5c   : > { %s252_s7 = sshll.u32 %s243_s28, 4  ;;  %s1654_s8 = scalar_lea.sflag [#allocation6], %s239_s16  ;;  %s1652_s7 = int_to_ptr.vmem [resolvable:$true] %s252_s7 }
  0x5d   : > { %s1650_s19 = scalar_select %p52_p13, %s1416_s22, %s54_s14  }
  0x5e   : > { %p1268_p5 = pneg %p1645_p0 }
  0x60   : > { %s1640_s12 = scalar_lea.hbm %s1862_s0, %s1844_s17  ;;  %s1271_s17 = scalar_lea.hbm %s1862_s0, 768 }
  0x61   : > { %s1266_s10 = scalar_lea.hbm %s1640_s12, 256  ;;  %p1272_p12 = scmp.lt.u32.totalorder %s1640_s12, %s1862_s0 }
  0x62   : > { %p1267_p3 = scmp.ne.s32.totalorder %s1640_s12, %s1266_s10  ;;  %p1273_p1 = scmp.lt.u32.totalorder %s1271_s17, %s1266_s10 }
  0x63   : > { %p1275_p4 = scmp.lt.u32.totalorder %s1266_s10, %s1640_s12 }
  0x64   : > { %p1269_p7 = pnand %p1268_p5, %p1267_p3  ;;  %p1274_p2 = por %p1273_p1, %p1272_p12 }
  0x66   : > { %p1270_p9 = pneg %p1269_p7  ;;  %p1276_p6 = por %p1275_p4, %p1274_p2 }
  0x68   : > { %p1277_p10 = pnand %p1276_p6, %p1270_p9 }
  0x6a   : > { %1280 = shalt.err (!%p1277_p10)
}
  0x6b   : > { %s1281_s14 = scalar_lea.vmem %s1652_s7, 256  ;;  %s1442_s16 = smov [#allocation5]  }
  0x6c   : > { %p1282_p11 = scmp.ne.s32.totalorder %s1652_s7, %s1281_s14  ;;  %s1286_s28 = sshll.u32 %s1442_s16, 4  ;;  %s1287_s28 = int_to_ptr.vmem [resolvable:$false] %s1286_s28 }
  0x6d   : > { %s1288_s3 = scalar_lea.vmem %s1287_s28, 512  ;;  %p1289_p7 = scmp.lt.s32.totalorder %s1652_s7, %s1287_s28 }
  0x6e   : > { %p1284_p13 = pnand %p1282_p11, %p1268_p5  ;;  %p1290_p12 = scmp.lt.s32.totalorder %s1288_s3, %s1281_s14 }
  0x70   : > { %p1285_p3 = pneg %p1284_p13  ;;  %p1291_p1 = por %p1290_p12, %p1289_p7 }
  0x72   : > { %p1292_p2 = pnand %p1291_p1, %p1285_p3 }
  0x74   : > { %1295 = shalt.err (!%p1292_p2)
}
  0x75   : > { %s1864_s13 = smov 4   ;;  %s1865_s17 = smov 64  }
  0x76   : > { %1104 = dma.hbm_to_vmem [thread:$0]  (!%p1645_p0), %s1640_s12, 256, %s1652_s7, %s1654_s8, %s1865_s17, %s1865_s17, %s1864_s13  }
  0x77   : > { %s1866_s10 = sshll.u32 %s1432_s4, 8  ;;  %s266_s28 = scalar_lea.vmem [#allocation8], %s1631_s18 }
  0x78   : > { %s1690_s14 = scalar_lea.hbm %s1832_s1, %s1866_s10  ;;  %s273_s3 = sshll.u32 %s266_s28, 4  ;;  %s1694_s3 = int_to_ptr.vmem [resolvable:$true] %s273_s3 }
  0x79   : > { %s262_s0 = sand.u32 1, %s1436_s26   ;;  %s1296_s25 = scalar_lea.hbm %s1690_s14, 256 }
  0x7a   : > { %s1696_s9 = scalar_lea.sflag [#allocation9], %s262_s0  ;;  %p1297_p9 = scmp.ne.s32.totalorder %s1690_s14, %s1296_s25 }
  0x7b   : > { %s1301_s8 = scalar_lea.hbm %s1832_s1, 768  ;;  %p1302_p10 = scmp.lt.u32.totalorder %s1690_s14, %s1832_s1 }
  0x7c   : > { %p1299_p4 = pnand %p1297_p9, %p1268_p5  ;;  %p1303_p11 = scmp.lt.u32.totalorder %s1301_s8, %s1296_s25 }
  0x7d   : > { %p1305_p3 = scmp.lt.u32.totalorder %s1296_s25, %s1690_s14 }
  0x7e   : > { %p1300_p6 = pneg %p1299_p4  ;;  %p1304_p13 = por %p1303_p11, %p1302_p10 }
  0x80   : > { %p1306_p7 = por %p1305_p3, %p1304_p13 }
  0x82   : > { %p1307_p12 = pnand %p1306_p7, %p1300_p6 }
  0x84   : > { %1310 = shalt.err (!%p1307_p12)
}
  0x85   : > { %s1311_s0 = scalar_lea.vmem %s1694_s3, 256  ;;  %s1443_s18 = smov [#allocation8]  }
  0x86   : > { %p1312_p1 = scmp.ne.s32.totalorder %s1694_s3, %s1311_s0  ;;  %s1316_s16 = sshll.u32 %s1443_s18, 4  ;;  %s1317_s16 = int_to_ptr.vmem [resolvable:$false] %s1316_s16 }
  0x87   : > { %s1318_s28 = scalar_lea.vmem %s1317_s16, 512  ;;  %p1319_p4 = scmp.lt.s32.totalorder %s1694_s3, %s1317_s16 }
  0x88   : > { %p1314_p2 = pnand %p1312_p1, %p1268_p5  ;;  %p1320_p10 = scmp.lt.s32.totalorder %s1318_s28, %s1311_s0 }
  0x8a   : > { %p1315_p9 = pneg %p1314_p2  ;;  %p1321_p11 = por %p1320_p10, %p1319_p4 }
  0x8c   : > { %p1322_p13 = pnand %p1321_p11, %p1315_p9 }
  0x8e   : > { %1325 = shalt.err (!%p1322_p13)
}
  0x8f   : > { %1107 = dma.hbm_to_vmem [thread:$0]  (!%p1645_p0), %s1690_s14, 256, %s1694_s3, %s1696_s9, %s1865_s17, %s1865_s17, %s1864_s13  }
  0x90   : > { %p1867_p5 = scmp.ne.s32.totalorder %s1853_s6, 0 }
  0x91   : > { %s1728_s25 = sand.u32 (!%p1867_p5), 1, %s1412_s21   ;;  %p1868_p6 = scmp.ne.s32.totalorder (!%p1867_p5), %s1851_s29, 0 }
  0x92   : > { %285 = sbr.rel (%p1867_p5) target bundleno = 1159 (0x487), region = 40  ;;  %s951_s7 = sshll.u32 (!%p1867_p5), %s1728_s25, 4 }
  0x93   : > { %s288_s12 = scalar_lea.sflag (!%p1867_p5), [#allocation6], %s1728_s25  ;;  %s1732_s8 = scalar_lea.vmem (!%p1867_p5), [#allocation5], %s951_s7 }
  0x99   : > { %1387 = dma.done.wait (%p1868_p6), %s288_s12, 256  }
  0x9a   : > { %1389 = vsyncadd (%p1868_p6), %s288_s12, 4294967040  ;;  %s296_s2 = sand.u32 1, %s1521_s27   ;;  %s1739_s9 = scalar_lea.vmem [#allocation8], %s951_s7 }
  0x9b   : > { %s297_s6 = scalar_lea.sflag [#allocation9], %s296_s2 }
  0x9c   : > { %1391 = dma.done.wait (%p1868_p6), %s297_s6, 256  }
  0x9d   : > { %1393 = vsyncadd (%p1868_p6), %s297_s6, 4294967040  ;;  %p1869_p0 = scmp.eq.s32.totalorder %s1521_s27, 0 }
  0x9f   : > { %1395 = dma.done.wait (%p1869_p0), [#allocation9], 1024   ;;  %p1870_p3 = pmov %p1869_p0 }
  0xa0   : > { %p1871_p7 = pmov %p1869_p0 }
  0xa1   : > { %1397 = vsyncadd (%p1870_p3), [#allocation9], 4294966272 }
  0xa2   : > { %1399 = dma.done.wait (%p1871_p7), [#allocation12], 1024   ;;  %p1872_p12 = pmov %p1869_p0 }
  0xa3   : > { %s955_s13 = sshll.u32 %s1728_s25, 5  ;;  %p345_p1 = scmp.eq.s32.totalorder %s1420_s23, 0 }
  0xa4   : > { %1401 = vsyncadd (%p1872_p12), [#allocation12], 4294966272  ;;  %s1755_s17 = scalar_lea.vmem [#allocation13], %s955_s13  ;;  %v1188_v0 = vld [vmem:[#allocation10] sm:$0xff] (%p345_p1)   ;;  %v1189_v1 = vld [vmem:[#allocation10 + $0x8] sm:$0xff] (%p345_p1)  }
  0xa5   : > { %350 = sbr.rel (!%p345_p1) target bundleno = 415 (0x19f), region = 60  ;;  %1024 = vmatprep.subr.bf16.mxu0 (%p345_p1), %v1188_v0  ;;  %v1190_v2 = vld [vmem:[#allocation10 + $0x10] sm:$0xff] (%p345_p1)   ;;  %v1191_v3 = vld [vmem:[#allocation10 + $0x18] sm:$0xff] (%p345_p1)   ;;  %v1192_v5 = vld [vmem:[#allocation10 + $0x20] sm:$0xff] (%p345_p1)  }
  0xa6   : > { %1025 = vmatpush3.bf16.msra.mxu0 (%p345_p1), %v1188_v0  ;;  %v1196_v4 = vld [vmem:[%s1739_s9] sm:$0xff] (%p345_p1)   ;;  %v1193_v6 = vld [vmem:[#allocation10 + $0x28] sm:$0xff] (%p345_p1)   ;;  %v1195_v8 = vld [vmem:[#allocation10 + $0x38] sm:$0xff] (%p345_p1)  }
  0xa7   : > { %1026 = vmatprep.subr.bf16.mxu0 (%p345_p1), %v1189_v1  ;;  %1040 = vmatprep.mubr.bf16.mxu0 (%p345_p1), %v1196_v4  ;;  %v1194_v7 = vld [vmem:[#allocation10 + $0x30] sm:$0xff] (%p345_p1)   ;;  %v1197_v9 = vld [vmem:[%s1739_s9 + $0x8] sm:$0xff] (%p345_p1)  }
  0xaa   : > { %1027 = vmatpush3.bf16.msra.mxu0 (%p345_p1), %v1189_v1 }
  0xab   : > { %1028 = vmatprep.subr.bf16.mxu0 (%p345_p1), %v1190_v2 }
  0xae   : > { %1029 = vmatpush3.bf16.msra.mxu0 %v1190_v2 }
  0xaf   : > { %1030 = vmatprep.subr.bf16.mxu0 %v1191_v3 }
  0xb2   : > { %1031 = vmatpush3.bf16.msra.mxu0 %v1191_v3 }
  0xb3   : > { %1032 = vmatprep.subr.bf16.mxu0 %v1192_v5 }
  0xb6   : > { %1033 = vmatpush3.bf16.msra.mxu0 %v1192_v5 }
  0xb7   : > { %1034 = vmatprep.subr.bf16.mxu0 %v1193_v6 }
  0xba   : > { %1035 = vmatpush3.bf16.msra.mxu0 %v1193_v6 }
  0xbb   : > { %1036 = vmatprep.subr.bf16.mxu0 %v1194_v7 }
  0xbe   : > { %1037 = vmatpush3.bf16.msra.mxu0 %v1194_v7 }
  0xbf   : > { %1038 = vmatprep.subr.bf16.mxu0 %v1195_v8 }
  0xc2   : > { %1039 = vmatpush3.bf16.msra.mxu0 %v1195_v8 }
  0xc5   : > { %1041 = vmatmul.mubr.bf16.vlgmr.msra.gmra.mrb[0].mxu0 %v1197_v9 }
 0x198   : > { %v1042_v10 = vpop.f32.mrb[0].mxu0 }
 0x199   : > { %v465_v11 = vpop.f32.mrb[1].mxu0 }
 0x19a   : > { %v1043_v12 = vpop.f32.mrb[2].mxu0 }
 0x19b   : > { %v481_v13 = vpack.c.bf16 %v1043_v12, %v1042_v10  ;;  %v468_v14 = vpop.f32.mrb[3].mxu0 }
 0x19c   : > { %v480_v15 = vpack.c.bf16 %v468_v14, %v465_v11 }
 0x19d   : > { %483 = vst [vmem:[#allocation2 + $0x8] sm:$0xff] %v481_v13 }
 0x19e   : > { %482 = vst [vmem:[#allocation2] sm:$0xff] %v480_v15 }
 0x19f PF: > { %p967_p2 = scmp.ne.s32.totalorder %s1420_s23, 0 }
 0x1a0   : > { %vm504_vm0 = vcmask (!%p967_p2), 261120   ;;  %v1198_v18 = vld [vmem:[%s1732_s8] sm:$0xff] (!%p967_p2)   ;;  %v1199_v19 = vld [vmem:[%s1732_s8 + $0x8] sm:$0xff] (!%p967_p2)   ;;  %s487_s27 = sld [smem:[#allocation4]] (!%p967_p2) }
 0x1a1   : > { %486 = sbr.rel (%p967_p2) target bundleno = 651 (0x28b), region = 64  ;;  %1048 = vmatprep.mubr.msk.bf16.mxu0 (!%p967_p2), %vm504_vm0, %v1198_v18 }
 0x1a4   : > { %v493_v17 = vld [vmem:[#allocation2 + $0x8] sm:$0xff] (!%p967_p2) }
 0x1a5   : > { %v492_v16 = vld [vmem:[#allocation2] sm:$0xff] (!%p967_p2) }
 0x1a6   : > { %1044 = vmatprep.subr.bf16.mxu0 (!%p967_p2), %v492_v16  ;;  %v564_v20 = vstv (!%p967_p2), %s487_s27 }
 0x1a7   : > { %1045 = vmatpush3.bf16.msra.mxu0 (!%p967_p2), %v492_v16 }
 0x1a8   : > { %1046 = vmatprep.subr.bf16.mxu0 %v493_v17 }
 0x1ab   : > { %1047 = vmatpush3.bf16.msra.mxu0 %v493_v17 }
 0x1ae   : > { %1049 = vmatmul.mubr.msk.bf16.vlgmr.msra.gmra.mrb[0].mxu0 %vm504_vm0, %v1199_v19 }
 0x281   : > { %v1050_v21 = vpop.f32.mrb[0].mxu0 }
 0x282   : > { %v567_v22 = vmul.f32 %v1050_v21, %v564_v20  ;;  %v545_v23 = vpop.f32.mrb[1].mxu0  ;;  %vm562_vm1 = vcmp.ge.f32.partialorder %v1050_v21, 0.0 }
 0x283   : > { %v565_v24 = vmul.f32 %v564_v20, %v545_v23  ;;  %v1051_v25 = vpop.f32.mrb[2].mxu0  ;;  %vm560_vm2 = vcmp.ge.f32.partialorder %v545_v23, 0.0 }
 0x284   : > { %vm563_vm3 = vcmp.ge.f32.partialorder %v1051_v25, 0.0  ;;  %v568_v26 = vmul.f32 %v1051_v25, %v564_v20  ;;  %v548_v27 = vpop.f32.mrb[3].mxu0  ;;  %v571_v29 = vsel %vm562_vm1, %v1050_v21, %v567_v22 }
 0x285   : > { %vm561_vm4 = vcmp.ge.f32.partialorder %v548_v27, 0.0  ;;  %v566_v28 = vmul.f32 %v564_v20, %v548_v27  ;;  %v569_v31 = vsel %vm560_vm2, %v545_v23, %v565_v24 }
 0x286   : > { %v572_v30 = vsel %vm563_vm3, %v1051_v25, %v568_v26 }
 0x287   : > { %v574_v32 = vpack.c.bf16 %v572_v30, %v571_v29  ;;  %v570_v33 = vsel %vm561_vm4, %v548_v27, %v566_v28 }
 0x288   : > { %v573_v34 = vpack.c.bf16 %v570_v33, %v569_v31 }
 0x289   : > { %580 = vst [vmem:[#allocation3 + $0x8] sm:$0xff] %v574_v32 }
 0x28a   : > { %579 = vst [vmem:[#allocation3] sm:$0xff] %v573_v34 }
 0x28b PF: > { %p581_p9 = scmp.eq.s32.totalorder %s1420_s23, 1 }
 0x28c   : > { %v1200_v35 = vld [vmem:[#allocation11] sm:$0xff] (%p581_p9)   ;;  %v1201_v36 = vld [vmem:[#allocation11 + $0x8] sm:$0xff] (%p581_p9)   ;;  %v1202_v37 = vld [vmem:[#allocation11 + $0x10] sm:$0xff] (%p581_p9)  }
 0x28d   : > { %585 = sbr.rel (!%p581_p9) target bundleno = 903 (0x387), region = 68  ;;  %1052 = vmatprep.subr.bf16.mxu0 (%p581_p9), %v1200_v35  ;;  %v1203_v38 = vld [vmem:[#allocation11 + $0x18] sm:$0xff] (%p581_p9)   ;;  %v1204_v40 = vld [vmem:[#allocation11 + $0x20] sm:$0xff] (%p581_p9)   ;;  %v1205_v41 = vld [vmem:[#allocation11 + $0x28] sm:$0xff] (%p581_p9)  }
 0x28e   : > { %1053 = vmatpush3.bf16.msra.mxu0 (%p581_p9), %v1200_v35  ;;  %v1206_v42 = vld [vmem:[#allocation11 + $0x30] sm:$0xff] (%p581_p9)   ;;  %v1207_v43 = vld [vmem:[#allocation11 + $0x38] sm:$0xff] (%p581_p9)  }
 0x28f   : > { %1054 = vmatprep.subr.bf16.mxu0 (%p581_p9), %v1201_v36 }
 0x290   : > { %v587_v44 = vld [vmem:[#allocation3 + $0x8] sm:$0xff] (%p581_p9) }
 0x291   : > { %v586_v39 = vld [vmem:[#allocation3] sm:$0xff] (%p581_p9) }
 0x292   : > { %1055 = vmatpush3.bf16.msra.mxu0 (%p581_p9), %v1201_v36  ;;  %1068 = vmatprep.mubr.bf16.mxu0 (%p581_p9), %v586_v39 }
 0x293   : > { %1056 = vmatprep.subr.bf16.mxu0 (%p581_p9), %v1202_v37 }
 0x296   : > { %1057 = vmatpush3.bf16.msra.mxu0 %v1202_v37 }
 0x297   : > { %1058 = vmatprep.subr.bf16.mxu0 %v1203_v38 }
 0x29a   : > { %1059 = vmatpush3.bf16.msra.mxu0 %v1203_v38 }
 0x29b   : > { %1060 = vmatprep.subr.bf16.mxu0 %v1204_v40 }
 0x29e   : > { %1061 = vmatpush3.bf16.msra.mxu0 %v1204_v40 }
 0x29f   : > { %1062 = vmatprep.subr.bf16.mxu0 %v1205_v41 }
 0x2a2   : > { %1063 = vmatpush3.bf16.msra.mxu0 %v1205_v41 }
 0x2a3   : > { %1064 = vmatprep.subr.bf16.mxu0 %v1206_v42 }
 0x2a6   : > { %1065 = vmatpush3.bf16.msra.mxu0 %v1206_v42 }
 0x2a7   : > { %1066 = vmatprep.subr.bf16.mxu0 %v1207_v43 }
 0x2aa   : > { %1067 = vmatpush3.bf16.msra.mxu0 %v1207_v43 }
 0x2ad   : > { %1069 = vmatmul.mubr.bf16.vlgmr.msra.gmra.mrb[0].mxu0 %v587_v44 }
 0x380   : > { %v1070_v45 = vpop.f32.mrb[0].mxu0 }
 0x381   : > { %v686_v46 = vpop.f32.mrb[1].mxu0 }
 0x382   : > { %v1071_v47 = vpop.f32.mrb[2].mxu0 }
 0x383   : > { %v702_v48 = vpack.c.bf16 %v1071_v47, %v1070_v45  ;;  %v689_v49 = vpop.f32.mrb[3].mxu0 }
 0x384   : > { %v701_v50 = vpack.c.bf16 %v689_v49, %v686_v46 }
 0x385   : > { %704 = vst [vmem:[#allocation2 + $0x8] sm:$0xff] %v702_v48 }
 0x386   : > { %703 = vst [vmem:[#allocation2] sm:$0xff] %v701_v50 }
 0x387 PF: > { %p981_p4 = scmp.ne.s32.totalorder %s1420_s23, 1 }
 0x388   : > { %vm724_vm5 = vcmask (!%p981_p4), 261120   ;;  %v1208_v53 = vld [vmem:[%s1732_s8] sm:$0xff] (!%p981_p4)   ;;  %v1209_v54 = vld [vmem:[%s1732_s8 + $0x8] sm:$0xff] (!%p981_p4)  }
 0x389   : > { %707 = sbr.rel (%p981_p4) target bundleno = 1134 (0x46e), region = 72  ;;  %1076 = vmatprep.mubr.msk.bf16.mxu0 (!%p981_p4), %vm724_vm5, %v1208_v53 }
 0x38c   : > { %v713_v52 = vld [vmem:[#allocation2 + $0x8] sm:$0xff] (!%p981_p4) }
 0x38d   : > { %v712_v51 = vld [vmem:[#allocation2] sm:$0xff] (!%p981_p4) }
 0x38e   : > { %1072 = vmatprep.subr.bf16.mxu0 (!%p981_p4), %v712_v51 }
 0x38f   : > { %1073 = vmatpush3.bf16.msra.mxu0 (!%p981_p4), %v712_v51 }
 0x390   : > { %1074 = vmatprep.subr.bf16.mxu0 %v713_v52 }
 0x393   : > { %1075 = vmatpush3.bf16.msra.mxu0 %v713_v52 }
 0x396   : > { %1077 = vmatmul.mubr.msk.bf16.vlgmr.msra.gmra.mrb[0].mxu0 %vm724_vm5, %v1209_v54 }
 0x469   : > { %v1078_v55 = vpop.f32.mrb[0].mxu0 }
 0x46a   : > { %782 = vst [vmem:[%s1755_s17 + $0x10] sm:$0xff] %v1078_v55  ;;  %v765_v56 = vpop.f32.mrb[1].mxu0 }
 0x46b   : > { %780 = vst [vmem:[%s1755_s17] sm:$0xff] %v765_v56  ;;  %v1079_v57 = vpop.f32.mrb[2].mxu0 }
 0x46c   : > { %783 = vst [vmem:[%s1755_s17 + $0x18] sm:$0xff] %v1079_v57  ;;  %v768_v58 = vpop.f32.mrb[3].mxu0 }
 0x46d   : > { %781 = vst [vmem:[%s1755_s17 + $0x8] sm:$0xff] %v768_v58 }
 0x46e PF: > { %s995_s23 = sshll.u32 %s1424_s24, 9  ;;  %s801_s10 = sshll.u32 %s1755_s17, 4  ;;  %s1777_s10 = int_to_ptr.vmem [resolvable:$true] %s801_s10 }
 0x46f   : > { %s1774_s3 = scalar_lea.hbm %s1836_s5, %s995_s23  ;;  %s785_s15 = scalar_lea.sflag [#allocation7], %s1728_s25 }
 0x470   : > { %s1326_s0 = scalar_lea.vmem %s1777_s10, 512  ;;  %s1444_s18 = smov [#allocation13]  }
 0x471   : > { %p1327_p10 = scmp.ne.s32.totalorder %s1777_s10, %s1326_s0  ;;  %s1330_s16 = sshll.u32 %s1444_s18, 4  ;;  %s1331_s16 = int_to_ptr.vmem [resolvable:$false] %s1330_s16 }
 0x472   : > { %s1332_s24 = scalar_lea.vmem %s1331_s16, 1024  ;;  %p1333_p5 = scmp.lt.s32.totalorder %s1777_s10, %s1331_s16 }
 0x473   : > { %p1328_p11 = pnand %p1327_p10, %p1622_p8  ;;  %p1334_p6 = scmp.lt.s32.totalorder %s1332_s24, %s1326_s0 }
 0x475   : > { %p1329_p13 = pneg %p1328_p11  ;;  %p1335_p0 = por %p1334_p6, %p1333_p5 }
 0x477   : > { %p1336_p3 = pnand %p1335_p0, %p1329_p13 }
 0x479   : > { %1339 = shalt.err (!%p1336_p3)
}
 0x47a   : > { %s1340_s28 = scalar_lea.hbm %s1774_s3, 512  ;;  %s1344_s8 = scalar_lea.hbm %s1836_s5, 1536 }
 0x47b   : > { %p1341_p7 = scmp.ne.s32.totalorder %s1774_s3, %s1340_s28  ;;  %p1345_p2 = scmp.lt.u32.totalorder %s1774_s3, %s1836_s5 }
 0x47c   : > { %p1346_p9 = scmp.lt.u32.totalorder %s1344_s8, %s1340_s28  ;;  %p1348_p10 = scmp.lt.u32.totalorder %s1340_s28, %s1774_s3 }
 0x47d   : > { %p1342_p12 = pnand %p1341_p7, %p1622_p8 }
 0x47e   : > { %p1347_p4 = por %p1346_p9, %p1345_p2 }
 0x47f   : > { %p1343_p1 = pneg %p1342_p12 }
 0x480   : > { %p1349_p11 = por %p1348_p10, %p1347_p4 }
 0x482   : > { %p1350_p13 = pnand %p1349_p11, %p1343_p1 }
 0x484   : > { %1353 = shalt.err (!%p1350_p13)
}
 0x485   : > { %s1445_s9 = smov 128   ;;  %s1446_s13 = smov 8  }
 0x486   : > { %1092 = dma.vmem_to_hbm [thread:$0]  (%p1622_p8), %s1777_s10, 512, %s1774_s3, %s785_s15, %s1445_s9, %s1445_s9, %s1446_s13  }
 0x487 PF: > { %p1117_p5 = scmp.ge.s32.totalorder %s1436_s26, 2  ;;  %s816_s17 = sand.u32 1, %s1408_s20  }
 0x488   : > { %p1873_p6 = scmp.ne.s32.totalorder %s1852_s30, 0  ;;  %s817_s27 = scalar_lea.sflag [#allocation7], %s816_s17 }
 0x48a   : > { %p1109_p0 = pnand %p1117_p5, %p1873_p6 }
 0x48c   : > { %1403 = dma.done.wait (!%p1109_p0), %s817_s27, 512  }
 0x48d   : > { %1405 = vsyncadd (!%p1109_p0), %s817_s27, 4294966784  ;;  %s26_s26 = sadd.s32 1, %s1436_s26   ;;  %s1874_s23 = sld [smem:[#allocation19_spill]] }
 0x48e   : > { %p23_p3 = scmp.ge.s32.totalorder %s26_s26, 8   ;;  %s1875_s25 = sld [smem:[#allocation20_spill]] }
 0x48f   : > { %s1876_s11 = sld [smem:[#allocation21_spill]]  ;;  %s1877_s20 = smov %s1412_s21 }
 0x490   : > { %s1878_s21 = smov %s1416_s22  ;;  %s1879_s22 = smov %s1650_s19 }
 0x491   : > { %s1880_s24 = smov %s1432_s4  ;;  %25 = sbr.rel (!%p23_p3) target bundleno = 15 (0xf), region = 123 }
 0x495   : > { %s1881_s4 = smov %s1876_s11 }
 0x498   :  { %822 = vsyncpa [#allocation6], 1 }
 0x499   :  { %824 = vsyncpa [#allocation6 + $0x1], 1 }
 0x49a   :  { %825 = vsyncpa [#allocation9], 1 }
 0x49b   :  { %827 = vsyncpa [#allocation9 + $0x1], 1 }
 0x49c   :  { %828 = vsyncpa [#allocation12], 1 }
 0x49d   :  { %829 = vsyncpa [#allocation7], 1 }
 0x49e   :  { %831 = vsyncpa [#allocation7 + $0x1], 1 }

</bundles_post_ra>
